<compile_context>
chip_gen: v5e
topology: v5e:2x2
jax: 0.10.0
libtpu: 0.0.40
codegen_flags: <defaults>
</compile_context>

<pallas_src>
import jax
import jax.numpy as jnp
from jax.experimental import pallas as pl
from jax.experimental.pallas import tpu as pltpu

_LANE = 128          # lane width (last dim of a vreg)
_TM_DEFAULT = 512    # rows per tile -> 512x128 f32 = 256 KiB per operand tile
_PALLAS_MIN_N = 4096 # below this, the pallas_call boundary is pure overhead


def _axpby_kernel(ab_ref, x0_ref, x1_ref, o_ref):
    # ab_ref: SMEM (2,) f32  -> ab_ref[0] = a, ab_ref[1] = b  (scalar prefetch)
    # x0_ref: VMEM (TM, 128) -> tile of data[0] viewed as (M, 128)
    # x1_ref: VMEM (TM, 128) -> tile of data[1] viewed as (M, 128)
    # o_ref : VMEM (TM, 128)
    a = ab_ref[0]
    b = ab_ref[1]
    acc = a * x0_ref[...].astype(jnp.float32) + b * x1_ref[...].astype(jnp.float32)
    o_ref[...] = acc.astype(o_ref.dtype)


def _model_forward_pallas(data, ab):
    """data: (2, N) with N a multiple of 128; ab: (2,) f32 -> (N,)"""
    n = data.shape[1]
    m = n // _LANE
    tm = min(_TM_DEFAULT, m)  # full-dim block if small, else 512 (multiple of 8)

    # Free row-major views: each row of `data` becomes a dense (M, 128) slab.
    x0 = data[0].reshape(m, _LANE)
    x1 = data[1].reshape(m, _LANE)

    out = pl.pallas_call(
        _axpby_kernel,
        out_shape=jax.ShapeDtypeStruct((m, _LANE), data.dtype),
        grid_spec=pltpu.PrefetchScalarGridSpec(
            num_scalar_prefetch=1,                     # ab -> SMEM
            grid=(pl.cdiv(m, tm),),
            in_specs=[
                pl.BlockSpec((tm, _LANE), lambda i, ab_ref: (i, 0)),
                pl.BlockSpec((tm, _LANE), lambda i, ab_ref: (i, 0)),
            ],
            out_specs=pl.BlockSpec((tm, _LANE), lambda i, ab_ref: (i, 0)),
        ),
        compiler_params=pltpu.CompilerParams(
            dimension_semantics=("parallel",),         # 2x TC sharding on v7x
        ),
    )(ab, x0, x1)
    return out.reshape(n)


def model_forward(data, a, b):
    """data: (2, N), a: (1,) f32, b: (1,) f32 -> (N,)"""
    two, n = data.shape
    assert two == 2
    # Keep the learnable scalars in f32 regardless of data dtype.
    ab = jnp.concatenate([a, b]).astype(jnp.float32)  # (2,)

    if n < _PALLAS_MIN_N:
        # Tiny input: the pallas_call boundary is pure overhead; let XLA fuse.
        return (ab[0] * data[0, :].astype(jnp.float32)
                + ab[1] * data[1, :].astype(jnp.float32)).astype(data.dtype)

    # Pad N up to a multiple of 128 so the lane-dense (M, 128) view is exact.
    n_pad = pl.cdiv(n, _LANE) * _LANE
    data_p = data if n_pad == n else jnp.pad(data, ((0, 0), (0, n_pad - n)))
    out = _model_forward_pallas(data_p, ab)
    return out[:n]


if __name__ == "__main__":
    key = jax.random.PRNGKey(0)
    k_data, k_a, k_b = jax.random.split(key, 3)

    # Deterministic "parameters" (torch.rand(1) equivalents).
    a = jax.random.uniform(k_a, (1,), dtype=jnp.float32)
    b = jax.random.uniform(k_b, (1,), dtype=jnp.float32)

    # Exercise all three paths:
    #   256     -> tiny-N XLA fallback
    #   8192    -> Pallas dense path, single tile
    #   131107  -> Pallas dense path, padded (not a multiple of 128), 3 tiles
    for n in (256, 8192, 131107):
        data = jax.random.normal(jax.random.fold_in(k_data, n), (2, n),
                                 dtype=jnp.float32)
        out = jax.block_until_ready(model_forward(data, a, b))

        # Pure-JAX reference check.
        ref = a[0] * data[0, :] + b[0] * data[1, :]
        assert out.shape == (n,)
        assert jnp.allclose(out, ref, atol=1e-5, rtol=1e-5)

    print("KERNEL_OK")
</pallas_src>

<mosaic_0001>
module attributes {stable_mosaic.version = 11 : i64} {
  func.func @_axpby_kernel(%arg0: i32, %arg1: memref<2xf32, #tpu.memory_space<smem>>, %arg2: memref<64x128xf32, #tpu.memory_space<vmem>>, %arg3: memref<64x128xf32, #tpu.memory_space<vmem>>, %arg4: memref<64x128xf32, #tpu.memory_space<vmem>>) attributes {dimension_semantics = [#tpu.dimension_semantics<parallel>], iteration_bounds = array<i64: 1>, scalar_prefetch = 1 : i64, scratch_operands = 0 : i64, tpu.core_type = #tpu.core_type<tc>, window_params = [{transform_indices = @transform_0, window_bounds = array<i64: 64, 128>}, {transform_indices = @transform_1, window_bounds = array<i64: 64, 128>}, {transform_indices = @transform_2, window_bounds = array<i64: 64, 128>}]} {
    %c0 = arith.constant 0 : index
    %0 = memref.load %arg1[%c0] : memref<2xf32, #tpu.memory_space<smem>>
    %c1 = arith.constant 1 : index
    %1 = memref.load %arg1[%c1] : memref<2xf32, #tpu.memory_space<smem>>
    %c0_0 = arith.constant 0 : index
    %c0_1 = arith.constant 0 : index
    %2 = vector.load %arg2[%c0_0, %c0_1] : memref<64x128xf32, #tpu.memory_space<vmem>>, vector<64x128xf32>
    %3 = vector.broadcast %0 : f32 to vector<64x128xf32>
    %4 = arith.mulf %3, %2 : vector<64x128xf32>
    %c0_2 = arith.constant 0 : index
    %c0_3 = arith.constant 0 : index
    %5 = vector.load %arg3[%c0_2, %c0_3] : memref<64x128xf32, #tpu.memory_space<vmem>>, vector<64x128xf32>
    %6 = vector.broadcast %1 : f32 to vector<64x128xf32>
    %7 = arith.mulf %6, %5 : vector<64x128xf32>
    %8 = arith.addf %4, %7 : vector<64x128xf32>
    %c0_4 = arith.constant 0 : index
    %c0_5 = arith.constant 0 : index
    %9 = vector.load %arg4[%c0_4, %c0_5] : memref<64x128xf32, #tpu.memory_space<vmem>>, vector<64x128xf32>
    tpu.vector_store %arg4[%c0_4, %c0_5], %8 {strides = array<i32>} : memref<64x128xf32, #tpu.memory_space<vmem>>, vector<64x128xf32>,
    return
  }
  func.func @transform_0(%arg0: i32, %arg1: memref<2xf32, #tpu.memory_space<smem>>) -> (i32, i32) {
    %c0_i32 = arith.constant 0 : i32
    %c0_i32_0 = arith.constant 0 : i32
    return %arg0, %c0_i32 : i32, i32
  }
  func.func @transform_1(%arg0: i32, %arg1: memref<2xf32, #tpu.memory_space<smem>>) -> (i32, i32) {
    %c0_i32 = arith.constant 0 : i32
    %c0_i32_0 = arith.constant 0 : i32
    return %arg0, %c0_i32 : i32, i32
  }
  func.func @transform_2(%arg0: i32, %arg1: memref<2xf32, #tpu.memory_space<smem>>) -> (i32, i32) {
    %c0_i32 = arith.constant 0 : i32
    %c0_i32_0 = arith.constant 0 : i32
    return %arg0, %c0_i32 : i32, i32
  }
}

</mosaic_0001>

<bundles_post_ra>
// kernel: tpu_custom_call.1
= control target key start
LH: loop header
LB: loop body
LE: loop exit
PB: predicated region body
PF: predicated region fallthrough
CT: control target
= control target key end

     0   :  { %s224_s15 = smov [#allocation3]   ;;  %s271_s0 = inlined_call_operand.hbm [shape: f32[2], index: 0, kind: input, shape index: {}]   ;;  %s272_s1 = inlined_call_operand.hbm [shape: f32[64,128], index: 1, kind: input, shape index: {}]   ;;  %s273_s2 = inlined_call_operand.hbm [shape: f32[64,128], index: 2, kind: input, shape index: {}]   ;;  %s274_s3 = inlined_call_operand.hbm [shape: f32[64,128], index: 3, kind: output, shape index: {}]  }
   0x1   :  { %s9_s14 = sshll.u32 %s271_s0, 4  ;;  %s10_s14 = int_to_ptr.hbm [resolvable:$true] %s9_s14 }
   0x2   :  { %12 = dma.hbm_to_smem %s10_s14, 16, %s224_s15, [#allocation2] }
   0x3   :  { %216 = dma.done.wait [#allocation2], 16 }
   0x4   :  { %217 = vsyncadd [#allocation2], 4294967280 }
   0x5   :  { %15 = sfence }
   0x6   :  { %16 = vsyncpa [#allocation5], 0 }
   0x7   :  { %17 = vsyncpa [#allocation8], 0 }
   0x8   :  { %18 = vsyncpa [#allocation6], 0  ;;  %s23_s18 = sshll.u32 %s272_s1, 4  ;;  %s225_s19 = smov [#allocation4]   ;;  %s24_s18 = int_to_ptr.hbm [resolvable:$true] %s23_s18 }
   0x9   :  { %s25_s20 = sshll.u32 %s225_s19, 4  ;;  %s36_s0 = sshll.u32 %s273_s2, 4  ;;  %s26_s20 = int_to_ptr.vmem [resolvable:$true] %s25_s20  ;;  %s37_s0 = int_to_ptr.hbm [resolvable:$true] %s36_s0 }
   0xa   :  { %s226_s23 = smov 128   ;;  %s227_s24 = smov 8  }
   0xb   :  { %31 = dma.hbm_to_vmem [thread:$0]  %s24_s18, 1024, %s26_s20, [#allocation5], %s226_s23, %s226_s23, %s227_s24  }
   0xc   :  { %s228_s25 = smov [#allocation7]  }
   0xd   :  { %s38_s26 = sshll.u32 %s228_s25, 4  ;;  %s39_s26 = int_to_ptr.vmem [resolvable:$true] %s38_s26 }
   0xe   :  { %44 = dma.hbm_to_vmem [thread:$0]  %s37_s0, 1024, %s39_s26, [#allocation8], %s226_s23, %s226_s23, %s227_s24  }
   0xf   :  { %218 = dma.done.wait [#allocation5], 1024  }
  0x10   :  { %219 = vsyncadd [#allocation5], 4294966272 }
  0x11   :  { %220 = dma.done.wait [#allocation8], 1024  }
  0x12   :  { %221 = vsyncadd [#allocation8], 4294966272  ;;  %s53_s1 = sld [smem:[#allocation3]]  ;;  %v55_v0 = vld [vmem:[#allocation4] sm:$0xff]  ;;  %v56_v3 = vld [vmem:[#allocation4 + $0x8] sm:$0xff]  ;;  %s229_s27 = smov [#allocation9]  }
  0x13   :  { %s125_s2 = sld [smem:[#allocation3 + $0x1]]  ;;  %v72_v2 = vld [vmem:[#allocation7] sm:$0xff]  ;;  %v73_v7 = vld [vmem:[#allocation7 + $0x8] sm:$0xff]  ;;  %v57_v8 = vld [vmem:[#allocation4 + $0x10] sm:$0xff]  ;;  %s109_s28 = sshll.u32 %s229_s27, 4  ;;  %s110_s28 = int_to_ptr.vmem [resolvable:$true] %s109_s28 }
  0x14   :  { %v74_v9 = vld [vmem:[#allocation7 + $0x10] sm:$0xff]  ;;  %v58_v14 = vld [vmem:[#allocation4 + $0x18] sm:$0xff]  ;;  %v59_v16 = vld [vmem:[#allocation4 + $0x20] sm:$0xff]  ;;  %s111_s4 = sshll.u32 %s274_s3, 4  ;;  %s112_s4 = int_to_ptr.hbm [resolvable:$true] %s111_s4 }
  0x15   :  { %v75_v15 = vld [vmem:[#allocation7 + $0x18] sm:$0xff]  ;;  %v76_v20 = vld [vmem:[#allocation7 + $0x20] sm:$0xff]  ;;  %v60_v21 = vld [vmem:[#allocation4 + $0x28] sm:$0xff] }
  0x16   :  { %v77_v22 = vld [vmem:[#allocation7 + $0x28] sm:$0xff]  ;;  %v61_v27 = vld [vmem:[#allocation4 + $0x30] sm:$0xff]  ;;  %v62_v29 = vld [vmem:[#allocation4 + $0x38] sm:$0xff] }
  0x17   :  { %v78_v28 = vld [vmem:[#allocation7 + $0x30] sm:$0xff]  ;;  %v79_v34 = vld [vmem:[#allocation7 + $0x38] sm:$0xff] }
  0x18   :  { %v63_v1 = vstv %s53_s1 }
  0x19   :  { %v64_v4 = vmul.f32 %v63_v1, %v55_v0  ;;  %v80_v5 = vstv %s125_s2  ;;  %v65_v6 = vmul.f32 %v63_v1, %v56_v3  ;;  %v66_v12 = vmul.f32 %v63_v1, %v57_v8 }
  0x1a   :  { %v81_v10 = vmul.f32 %v80_v5, %v72_v2  ;;  %v82_v11 = vmul.f32 %v80_v5, %v73_v7  ;;  %v83_v13 = vmul.f32 %v80_v5, %v74_v9  ;;  %v67_v17 = vmul.f32 %v63_v1, %v58_v14 }
  0x1b   :  { %v84_v18 = vmul.f32 %v80_v5, %v75_v15  ;;  %v68_v19 = vmul.f32 %v63_v1, %v59_v16  ;;  %v85_v26 = vmul.f32 %v80_v5, %v76_v20  ;;  %v69_v31 = vmul.f32 %v63_v1, %v60_v21 }
  0x1c   :  { %v89_v23 = vadd.f32 %v81_v10, %v64_v4  ;;  %v90_v24 = vadd.f32 %v82_v11, %v65_v6  ;;  %v91_v25 = vadd.f32 %v83_v13, %v66_v12  ;;  %v86_v32 = vmul.f32 %v80_v5, %v77_v22 }
  0x1d   :  { %v92_v30 = vadd.f32 %v84_v18, %v67_v17  ;;  %v70_v33 = vmul.f32 %v63_v1, %v61_v27  ;;  %v93_v35 = vadd.f32 %v85_v26, %v68_v19  ;;  %v87_v36 = vmul.f32 %v80_v5, %v78_v28 }
  0x1e   :  { %97 = vst [vmem:[#allocation9] sm:$0xff] %v89_v23  ;;  %v71_v37 = vmul.f32 %v63_v1, %v62_v29  ;;  %v88_v38 = vmul.f32 %v80_v5, %v79_v34  ;;  %v94_v39 = vadd.f32 %v86_v32, %v69_v31 }
  0x1f   :  { %98 = vst [vmem:[#allocation9 + $0x8] sm:$0xff] %v90_v24  ;;  %v95_v40 = vadd.f32 %v87_v36, %v70_v33 }
  0x20   :  { %99 = vst [vmem:[#allocation9 + $0x10] sm:$0xff] %v91_v25  ;;  %v96_v41 = vadd.f32 %v88_v38, %v71_v37 }
  0x21   :  { %100 = vst [vmem:[#allocation9 + $0x18] sm:$0xff] %v92_v30 }
  0x22   :  { %101 = vst [vmem:[#allocation9 + $0x20] sm:$0xff] %v93_v35 }
  0x23   :  { %102 = vst [vmem:[#allocation9 + $0x28] sm:$0xff] %v94_v39 }
  0x24   :  { %103 = vst [vmem:[#allocation9 + $0x30] sm:$0xff] %v95_v40 }
  0x25   :  { %104 = vst [vmem:[#allocation9 + $0x38] sm:$0xff] %v96_v41 }
  0x26   :  { %117 = dma.vmem_to_hbm [thread:$0]  %s110_s28, 1024, %s112_s4, [#allocation6], %s226_s23, %s226_s23, %s227_s24  }
  0x27   :  { %222 = dma.done.wait [#allocation6], 1024  }
  0x28   :  { %223 = vsyncadd [#allocation6], 4294966272 }
  0x29   :  { %122 = vsyncpa [#allocation5], 1 }
  0x2a   :  { %123 = vsyncpa [#allocation8], 1 }
  0x2b   :  { %124 = vsyncpa [#allocation6], 1 }

</bundles_post_ra>
